<compile_context>
chip_gen: v6e
topology: v6e:2x2x1
jax: 0.10.0
libtpu: 0.0.40
codegen_flags: <defaults>
</compile_context>

<pallas_src>
import functools

import jax
import jax.numpy as jnp
from jax.experimental import pallas as pl
from jax.experimental.pallas import tpu as pltpu


def _round_up(x, m):
    return ((x + m - 1) // m) * m


def _cutmix_ce_kernel(preds_ref, tgt_ref, lam_ref, out_ref, acc_ref, *,
                      true_b, tile_rows, tiles_per_split):
    c = pl.program_id(0)            # core-split axis ("parallel")
    i = pl.program_id(1)            # batch-tile axis ("arbitrary", reduction)
    # UNclamped global tile index (the index_map clamps the DMA; rows of any
    # duplicated/overhang tile are masked out below, so nothing double-counts).
    tile_idx = c * tiles_per_split + i

    @pl.when(i == 0)
    def _():
        acc_ref[...] = jnp.zeros_like(acc_ref)

    preds = preds_ref[...]
    if preds.dtype != jnp.float32:          # per-tile cast only when needed
        preds = preds.astype(jnp.float32)
    tb, cdim = preds.shape

    lam = lam_ref[0, 0]                     # free SMEM scalar read
    t1 = tgt_ref[:, 0:1]                    # (tb, 1) int32
    t2 = tgt_ref[:, 1:2]                    # (tb, 1) int32

    # Stable row-wise log-sum-exp; `shifted` is reused by the gather path.
    m = jnp.max(preds, axis=-1, keepdims=True)
    shifted = preds - m
    lse = m + jnp.log(jnp.sum(jnp.exp(shifted), axis=-1, keepdims=True))

    # Narrow one-hot gathers (lane reductions on the XLU), combined at (tb,1).
    class_ids = jax.lax.broadcasted_iota(jnp.int32, (tb, cdim), 1)
    p1 = jnp.sum(jnp.where(class_ids == t1, shifted, 0.0), axis=-1, keepdims=True)
    p2 = jnp.sum(jnp.where(class_ids == t2, shifted, 0.0), axis=-1, keepdims=True)
    wlogit = lam * p1 + (1.0 - lam) * p2 + m   # = lam*logit1 + (1-lam)*logit2

    # NaN-safe select mask for the ragged last tile (no batch padding in HBM).
    row = tile_idx * tile_rows + jax.lax.broadcasted_iota(jnp.int32, (tb, 1), 0)
    per_row = jnp.where(row < true_b, lse - wlogit, 0.0)

    acc_ref[...] += jnp.sum(per_row, axis=0, keepdims=True)     # (1, 1) scratch

    @pl.when(i == pl.num_programs(1) - 1)
    def _():
        # Per-core partial (already divided by the TRUE batch size), broadcast
        # over this core's private (8, 128) output block.
        out_ref[...] = jnp.broadcast_to(
            acc_ref[...] * (1.0 / float(true_b)), out_ref.shape)


def cutmix_criterion(preds, targets, *, max_rows_per_tile=None):
    """preds: (B, C) float; targets: (B, 3) float32 packed as
    [:,0]=class1, [:,1]=class2, [0,2]=lam (constant over batch).
    Returns scalar f32 loss."""
    B, C = preds.shape
    itemsize = jnp.dtype(preds.dtype).itemsize

    # Generation-dependent VMEM budget (v7x has 64 MiB/TC, v5e/v6e 128 MiB).
    try:
        vmem_cap = int(pltpu.get_tpu_info().vmem_capacity_bytes)
        if vmem_cap <= 0:
            vmem_cap = 128 * 1024 * 1024
    except Exception:
        vmem_cap = 128 * 1024 * 1024
    vmem_limit = min(max(vmem_cap // 2, 16 * 1024 * 1024), 64 * 1024 * 1024)
    tile_budget = vmem_limit // 3          # preds is double-buffered (2x) + headroom

    # VMEM footprint per row is lane-padded to 128 even though the HBM DMA
    # only moves the true C columns.
    per_row_vmem = _round_up(C, 128) * itemsize + 128 * 4
    tb = tile_budget // per_row_vmem
    tb = min(int(tb), _round_up(B, 8))
    if max_rows_per_tile is not None:
        tb = min(tb, int(max_rows_per_tile))
    tb = max(8, (tb // 8) * 8)

    num_tiles = (B + tb - 1) // tb
    num_splits = 2 if num_tiles >= 2 else 1          # leading "parallel" axis
    tiles_per_split = (num_tiles + num_splits - 1) // num_splits
    last_tile = num_tiles - 1

    def tile_map(c, i):
        # Clamp so the generated DMA never points past the last block; the
        # kernel masks any overhang rows by the UNclamped global row index.
        return (jnp.minimum(c * tiles_per_split + i, last_tile), 0)

    t_ids = targets[:, :2].astype(jnp.int32)         # tiny (B, 2) HBM op
    lam = targets[0:1, 2:3].astype(jnp.float32)      # (1, 1) -> SMEM scalar

    cost = pl.CostEstimate(
        flops=8 * B * C + 16 * B,
        transcendentals=B * C + B,
        bytes_accessed=B * C * itemsize + B * 8 + num_splits * 8 * 128 * 4,
    )

    out = pl.pallas_call(
        functools.partial(_cutmix_ce_kernel, true_b=B, tile_rows=tb,
                          tiles_per_split=tiles_per_split),
        out_shape=jax.ShapeDtypeStruct((num_splits * 8, 128), jnp.float32),
        grid=(num_splits, tiles_per_split),
        in_specs=[
            pl.BlockSpec((tb, C), tile_map, memory_space=pltpu.VMEM),
            pl.BlockSpec((tb, 2), tile_map, memory_space=pltpu.VMEM),
            pl.BlockSpec((1, 1), lambda c, i: (0, 0), memory_space=pltpu.SMEM),
        ],
        out_specs=pl.BlockSpec((8, 128), lambda c, i: (c, 0),
                               memory_space=pltpu.VMEM),
        scratch_shapes=[pltpu.VMEM((1, 1), jnp.float32)],
        compiler_params=pltpu.CompilerParams(
            dimension_semantics=("parallel", "arbitrary"),
            vmem_limit_bytes=vmem_limit,
        ),
        cost_estimate=cost,
    )(preds, t_ids, lam)

    # One (already 1/B-scaled) partial per core split; summing them is trivial.
    return jnp.sum(out[0::8, 0])


def _reference(preds, targets):
    # Pure-JAX reference for correctness checking.
    t1 = targets[:, 0].astype(jnp.int32)
    t2 = targets[:, 1].astype(jnp.int32)
    lam = targets[0, 2]
    logp = jax.nn.log_softmax(preds.astype(jnp.float32), axis=-1)
    ce1 = -jnp.mean(jnp.take_along_axis(logp, t1[:, None], axis=-1))
    ce2 = -jnp.mean(jnp.take_along_axis(logp, t2[:, None], axis=-1))
    return lam * ce1 + (1.0 - lam) * ce2


if __name__ == "__main__":
    # Ragged batch (30) and a small class count (5, like CFG.target_size):
    # exercises the unpadded-C path, the ragged-row mask, the multi-tile
    # accumulator and the 2-way parallel core split.
    B, C = 30, 5
    key = jax.random.PRNGKey(0)
    k_pred, k_t1, k_t2 = jax.random.split(key, 3)

    preds = jax.random.normal(k_pred, (B, C), dtype=jnp.float32)
    targets1 = jax.random.randint(k_t1, (B,), 0, C)
    targets2 = jax.random.randint(k_t2, (B,), 0, C)
    lam = jnp.float32(0.7)
    targets = jnp.stack(
        [targets1.astype(jnp.float32),
         targets2.astype(jnp.float32),
         jnp.full((B,), lam, dtype=jnp.float32)],
        axis=1,
    )  # (B, 3)

    ref = _reference(preds, targets)

    # Default path: one big VMEM-budget tile (single ragged block).
    loss_big = cutmix_criterion(preds, targets)
    jax.block_until_ready(loss_big)
    assert jnp.allclose(loss_big, ref, rtol=1e-5, atol=1e-5), (loss_big, ref)

    # Forced small tile: 4 tiles -> 2-way parallel split + ragged last tile.
    loss_small = cutmix_criterion(preds, targets, max_rows_per_tile=8)
    jax.block_until_ready(loss_small)
    assert jnp.allclose(loss_small, ref, rtol=1e-5, atol=1e-5), (loss_small, ref)

    print("KERNEL_OK")
</pallas_src>

<mosaic_0001>
module attributes {stable_mosaic.version = 11 : i64} {
  func.func @_cutmix_ce_kernel(%arg0: i32, %arg1: i32, %arg2: memref<32x5xf32, #tpu.memory_space<vmem>>, %arg3: memref<32x2xi32, #tpu.memory_space<vmem>>, %arg4: memref<1x1xf32, #tpu.memory_space<smem>>, %arg5: memref<8x128xf32, #tpu.memory_space<vmem>>, %arg6: memref<1x1xf32, #tpu.memory_space<vmem>>) attributes {dimension_semantics = [#tpu.dimension_semantics<parallel>, #tpu.dimension_semantics<arbitrary>], iteration_bounds = array<i64: 1, 1>, scalar_prefetch = 0 : i64, scratch_operands = 1 : i64, tpu.core_type = #tpu.core_type<tc>, window_params = [{transform_indices = @transform_0, window_bounds = array<i64: 32, 5>}, {transform_indices = @transform_1, window_bounds = array<i64: 32, 2>}, {transform_indices = @transform_2, window_bounds = array<i64: 1, 1>}, {transform_indices = @transform_3, window_bounds = array<i64: 8, 128>}]} {
    %c1_i32 = arith.constant 1 : i32
    %0 = arith.muli %arg0, %c1_i32 : i32
    %1 = arith.addi %0, %arg1 : i32
    %c0_i32 = arith.constant 0 : i32
    %2 = arith.cmpi eq, %arg1, %c0_i32 : i32
    %3 = arith.extui %2 : i1 to i32
    %c0_i32_0 = arith.constant 0 : i32
    %4 = arith.cmpi ne, %3, %c0_i32_0 : i32
    scf.if %4 {
      %cst_21 = arith.constant 0.000000e+00 : f32
      %55 = vector.broadcast %cst_21 : f32 to vector<1x1xf32>
      %c0_22 = arith.constant 0 : index
      %c0_23 = arith.constant 0 : index
      %56 = vector.load %arg6[%c0_22, %c0_23] : memref<1x1xf32, #tpu.memory_space<vmem>>, vector<1x1xf32>
      tpu.vector_store %arg6[%c0_22, %c0_23], %55 {strides = array<i32>} : memref<1x1xf32, #tpu.memory_space<vmem>>, vector<1x1xf32>,
    } else {
    }
    %c0 = arith.constant 0 : index
    %c0_1 = arith.constant 0 : index
    %5 = vector.load %arg2[%c0, %c0_1] : memref<32x5xf32, #tpu.memory_space<vmem>>, vector<32x5xf32>
    %c0_2 = arith.constant 0 : index
    %c0_3 = arith.constant 0 : index
    %6 = memref.load %arg4[%c0_2, %c0_3] : memref<1x1xf32, #tpu.memory_space<smem>>
    %c0_4 = arith.constant 0 : index
    %c0_5 = arith.constant 0 : index
    %7 = vector.load %arg3[%c0_4, %c0_5] : memref<32x2xi32, #tpu.memory_space<vmem>>, vector<32x1xi32>
    %c0_6 = arith.constant 0 : index
    %c1 = arith.constant 1 : index
    %8 = vector.load %arg3[%c0_6, %c1] : memref<32x2xi32, #tpu.memory_space<vmem>>, vector<32x1xi32>
    %cst = arith.constant dense<0xFF800000> : vector<32xf32>
    %9 = vector.multi_reduction <maximumf>, %5, %cst [1] : vector<32x5xf32> to vector<32xf32>
    %10 = vector.shape_cast %9 : vector<32xf32> to vector<32x1xf32>
    %11 = vector.broadcast %10 : vector<32x1xf32> to vector<32x5xf32>
    %12 = arith.subf %5, %11 : vector<32x5xf32>
    %13 = math.exp %12 : vector<32x5xf32>
    %cst_7 = arith.constant dense<0.000000e+00> : vector<32xf32>
    %14 = vector.multi_reduction <add>, %13, %cst_7 [1] : vector<32x5xf32> to vector<32xf32>
    %15 = vector.shape_cast %14 : vector<32xf32> to vector<32x1xf32>
    %16 = math.log %15 : vector<32x1xf32>
    %17 = arith.addf %10, %16 : vector<32x1xf32>
    %18 = tpu.iota {dimensions = array<i32: 1>} : vector<32x5xi32>
    %19 = vector.broadcast %7 : vector<32x1xi32> to vector<32x5xi32>
    %20 = arith.cmpi eq, %18, %19 : vector<32x5xi32>
    %cst_8 = arith.constant 0.000000e+00 : f32
    %21 = vector.broadcast %cst_8 : f32 to vector<32x5xf32>
    %22 = arith.select %20, %12, %21 : vector<32x5xi1>, vector<32x5xf32>
    %cst_9 = arith.constant dense<0.000000e+00> : vector<32xf32>
    %23 = vector.multi_reduction <add>, %22, %cst_9 [1] : vector<32x5xf32> to vector<32xf32>
    %24 = vector.shape_cast %23 : vector<32xf32> to vector<32x1xf32>
    %25 = vector.broadcast %8 : vector<32x1xi32> to vector<32x5xi32>
    %26 = arith.cmpi eq, %18, %25 : vector<32x5xi32>
    %cst_10 = arith.constant 0.000000e+00 : f32
    %27 = vector.broadcast %cst_10 : f32 to vector<32x5xf32>
    %28 = arith.select %26, %12, %27 : vector<32x5xi1>, vector<32x5xf32>
    %cst_11 = arith.constant dense<0.000000e+00> : vector<32xf32>
    %29 = vector.multi_reduction <add>, %28, %cst_11 [1] : vector<32x5xf32> to vector<32xf32>
    %30 = vector.shape_cast %29 : vector<32xf32> to vector<32x1xf32>
    %31 = vector.broadcast %6 : f32 to vector<32x1xf32>
    %32 = arith.mulf %31, %24 : vector<32x1xf32>
    %cst_12 = arith.constant 1.000000e+00 : f32
    %33 = arith.subf %cst_12, %6 : f32
    %34 = vector.broadcast %33 : f32 to vector<32x1xf32>
    %35 = arith.mulf %34, %30 : vector<32x1xf32>
    %36 = arith.addf %32, %35 : vector<32x1xf32>
    %37 = arith.addf %36, %10 : vector<32x1xf32>
    %c32_i32 = arith.constant 32 : i32
    %38 = arith.muli %1, %c32_i32 : i32
    %39 = tpu.iota {dimensions = array<i32: 0>} : vector<32x1xi32>
    %40 = vector.broadcast %38 : i32 to vector<32x1xi32>
    %41 = arith.addi %40, %39 : vector<32x1xi32>
    %c30_i32 = arith.constant 30 : i32
    %42 = vector.broadcast %c30_i32 : i32 to vector<32x1xi32>
    %43 = arith.cmpi slt, %41, %42 : vector<32x1xi32>
    %44 = arith.subf %17, %37 : vector<32x1xf32>
    %cst_13 = arith.constant 0.000000e+00 : f32
    %45 = vector.broadcast %cst_13 : f32 to vector<32x1xf32>
    %46 = arith.select %43, %44, %45 : vector<32x1xi1>, vector<32x1xf32>
    %c0_14 = arith.constant 0 : index
    %c0_15 = arith.constant 0 : index
    %47 = vector.load %arg6[%c0_14, %c0_15] : memref<1x1xf32, #tpu.memory_space<vmem>>, vector<1x1xf32>
    %cst_16 = arith.constant dense<0.000000e+00> : vector<1xf32>
    %48 = vector.multi_reduction <add>, %46, %cst_16 [0] : vector<32x1xf32> to vector<1xf32>
    %49 = vector.shape_cast %48 : vector<1xf32> to vector<1x1xf32>
    %50 = arith.addf %47, %49 : vector<1x1xf32>
    %c0_17 = arith.constant 0 : index
    %c0_18 = arith.constant 0 : index
    %51 = vector.load %arg6[%c0_17, %c0_18] : memref<1x1xf32, #tpu.memory_space<vmem>>, vector<1x1xf32>
    tpu.vector_store %arg6[%c0_17, %c0_18], %50 {strides = array<i32>} : memref<1x1xf32, #tpu.memory_space<vmem>>, vector<1x1xf32>,
    %c0_i32_19 = arith.constant 0 : i32
    %52 = arith.cmpi eq, %arg1, %c0_i32_19 : i32
    %53 = arith.extui %52 : i1 to i32
    %c0_i32_20 = arith.constant 0 : i32
    %54 = arith.cmpi ne, %53, %c0_i32_20 : i32
    scf.if %54 {
      %c0_21 = arith.constant 0 : index
      %c0_22 = arith.constant 0 : index
      %55 = vector.load %arg6[%c0_21, %c0_22] : memref<1x1xf32, #tpu.memory_space<vmem>>, vector<1x1xf32>
      %cst_23 = arith.constant 0.0333333351 : f32
      %56 = vector.broadcast %cst_23 : f32 to vector<1x1xf32>
      %57 = arith.mulf %55, %56 : vector<1x1xf32>
      %58 = vector.shape_cast %57 : vector<1x1xf32> to vector<1x1xf32>
      %59 = vector.broadcast %58 : vector<1x1xf32> to vector<8x128xf32>
      %c0_24 = arith.constant 0 : index
      %c0_25 = arith.constant 0 : index
      %60 = vector.load %arg5[%c0_24, %c0_25] : memref<8x128xf32, #tpu.memory_space<vmem>>, vector<8x128xf32>
      tpu.vector_store %arg5[%c0_24, %c0_25], %59 {strides = array<i32>} : memref<8x128xf32, #tpu.memory_space<vmem>>, vector<8x128xf32>,
    } else {
    }
    return
  }
  func.func @transform_0(%arg0: i32, %arg1: i32) -> (i32, i32) {
    %c1_i32 = arith.constant 1 : i32
    %0 = arith.muli %arg0, %c1_i32 : i32
    %1 = arith.addi %0, %arg1 : i32
    %c0_i32 = arith.constant 0 : i32
    %2 = arith.minsi %1, %c0_i32 : i32
    %c0_i32_0 = arith.constant 0 : i32
    %c0_i32_1 = arith.constant 0 : i32
    return %2, %c0_i32_0 : i32, i32
  }
  func.func @transform_1(%arg0: i32, %arg1: i32) -> (i32, i32) {
    %c1_i32 = arith.constant 1 : i32
    %0 = arith.muli %arg0, %c1_i32 : i32
    %1 = arith.addi %0, %arg1 : i32
    %c0_i32 = arith.constant 0 : i32
    %2 = arith.minsi %1, %c0_i32 : i32
    %c0_i32_0 = arith.constant 0 : i32
    %c0_i32_1 = arith.constant 0 : i32
    return %2, %c0_i32_0 : i32, i32
  }
  func.func @transform_2(%arg0: i32, %arg1: i32) -> (i32, i32) {
    %c0_i32 = arith.constant 0 : i32
    %c0_i32_0 = arith.constant 0 : i32
    %c0_i32_1 = arith.constant 0 : i32
    return %c0_i32, %c0_i32_0 : i32, i32
  }
  func.func @transform_3(%arg0: i32, %arg1: i32) -> (i32, i32) {
    %c0_i32 = arith.constant 0 : i32
    %c0_i32_0 = arith.constant 0 : i32
    return %arg0, %c0_i32 : i32, i32
  }
}

</mosaic_0001>

<bundles_post_ra>
// kernel: tpu_custom_call.1
= control target key start
LH: loop header
LB: loop body
LE: loop exit
PB: predicated region body
PF: predicated region fallthrough
CT: control target
= control target key end

     0   :  { %vm96_vm0 = vcmask 39936   ;;  %v356_v6 = vmov 0   ;;  %s453_s0 = inlined_call_operand.vmem [shape: f32[30,5], index: 0, kind: input, shape index: {}]   ;;  %s454_s1 = inlined_call_operand.vmem [shape: s32[30,2], index: 1, kind: input, shape index: {}]   ;;  %s455_s2 = inlined_call_operand.<no memory space> [shape: f32[1,1], index: 2, kind: input, shape index: {}]   ;;  %s456_s3 = inlined_call_operand.hbm [shape: f32[8,128], index: 3, kind: output, shape index: {}]  }
   0x1   :  { %v89_v0 = vld [vmem:[%s453_s0 + $0x10] sm:$0xff]  ;;  %v87_v1 = vld [vmem:[%s453_s0] sm:$0xff]  ;;  %v90_v2 = vld [vmem:[%s453_s0 + $0x18] sm:$0xff]  ;;  %312 = vset.pattern.permute.xlu1 %v356_v6  ;;  %311 = vset.pattern.permute.xlu0 %v356_v6 }
   0x2   :  { %v103_v3 = vsel %vm96_vm0, %v89_v0, -inf  ;;  %v97_v4 = vsel %vm96_vm0, %v87_v1, -inf  ;;  %v88_v5 = vld [vmem:[%s453_s0 + $0x8] sm:$0xff] }
   0x3   :  { %104 = vmax.xlane.f32.xlu1 %v103_v3  ;;  %98 = vmax.xlane.f32.xlu0 %v97_v4 }
   0x4   :  { %9 = vsyncpa [#allocation5], 0  ;;  %v106_v7 = vsel %vm96_vm0, %v90_v2, -inf  ;;  %v100_v8 = vsel %vm96_vm0, %v88_v5, -inf  ;;  %v93_v9 = vld [vmem:[%s454_s1 + $0x8] sm:$0xff]  ;;  %v92_v10 = vld [vmem:[%s454_s1] sm:$0xff]  ;;  %v145_v27 = vlaneseq }
   0x5   :  { %v357_v11 = vmov 1   ;;  %v94_v12 = vld [vmem:[%s454_s1 + $0x10] sm:$0xff]  ;;  %v95_v13 = vld [vmem:[%s454_s1 + $0x18] sm:$0xff]  ;;  %vm85_vm9 = vcmask 0   ;;  %v358_v60 = vmov 0.0   ;;  %s216_s28 = ssub.f32 1.0, %s455_s2 }
   0x6   :  { %v146_v29 = vand.u32 127, %v145_v27  ;;  %86 = vst.msk [vmem:[#allocation2] sm:$0x1] %vm85_vm9, %v358_v60 }
   0x7   :  { %107 = vmax.xlane.f32.xlu1 %v106_v7  ;;  %101 = vmax.xlane.f32.xlu0 %v100_v8  ;;  %v217_v4 = vstv %s216_s28 }
  0x18   :  { %151 = vperm.xlu1 %312, %v93_v9  }
  0x1c   :  { %313 = vset.pattern.permute.xlu1 %v357_v11 }
  0x1d   :  { %180 = vperm.xlu1 %313, %v92_v10   ;;  %148 = vperm.xlu0 %311, %v92_v10  }
  0x21   :  { %183 = vperm.xlu1 %313, %v93_v9  }
  0x25   :  { %314 = vset.pattern.permute.xlu1 %v356_v6 }
  0x26   :  { %154 = vperm.xlu1 %314, %v94_v12  }
  0x2a   :  { %315 = vset.pattern.permute.xlu1 %v357_v11 }
  0x2b   :  { %186 = vperm.xlu1 %315, %v94_v12  }
  0x2f   :  { %316 = vset.pattern.permute.xlu1 %v356_v6 }
  0x30   :  { %157 = vperm.xlu1 %316, %v95_v13  }
  0x34   :  { %317 = vset.pattern.permute.xlu1 %v357_v11 }
  0x35   :  { %189 = vperm.xlu1 %317, %v95_v13  }
  0x8c   :  { %v408_v14 = vpop.xlane.xlu1 %104  ;;  %v410_v15 = vpop.xlane.xlu0 %98 }
  0x8d   :  { %v109_v16 = vsub.f32 %v87_v1, %v410_v15  ;;  %v111_v18 = vsub.f32 %v89_v0, %v408_v14 }
  0x8f   :  { %v113_v17 = vmul.f32 1.442695, %v109_v16  ;;  %v117_v25 = vmul.f32 1.442695, %v111_v18 }
  0x90   :  { %v414_v19 = vpop.xlane.xlu1 %107  ;;  %v416_v20 = vpop.xlane.xlu0 %101 }
  0x91   :  { %v112_v21 = vsub.f32 %v90_v2, %v414_v19  ;;  %v110_v22 = vsub.f32 %v88_v5, %v416_v20  ;;  %318 = vpow2.f32 %v113_v17  ;;  %v211_v5 = vstv %s455_s2  ;;  %s359_s2 = smov [#allocation4]  }
  0x92   :  { %s287_s4 = sshll.u32 %s359_s2, 4  ;;  %s288_s4 = int_to_ptr.vmem [resolvable:$true] %s287_s4 }
  0x93   :  { %v119_v23 = vmul.f32 1.442695, %v112_v21  ;;  %v115_v24 = vmul.f32 1.442695, %v110_v22  ;;  %s334_s5 = scalar_lea.vmem %s288_s4, 128  ;;  %p339_p1 = scmp.lt.s32.totalorder %s288_s4, %s288_s4 }
  0x94   :  { %v152_v26 = vpop.permute.xlu1 %151  ;;  %p335_p0 = scmp.ne.s32.totalorder %s288_s4, %s334_s5  ;;  %p340_p2 = scmp.lt.s32.totalorder %s334_s5, %s334_s5 }
  0x95   :  { %320 = vpow2.f32 %v119_v23  ;;  %vm160_vm1 = vcmp.eq.s32.totalorder %v146_v29, %v152_v26 }
  0x96   :  { %322 = vpow2.f32 %v115_v24  ;;  %v164_v34 = vsel %vm160_vm1, %v110_v22, 0.0  ;;  %p341_p3 = por %p340_p2, %p339_p1 }
  0x97   :  { %324 = vpow2.f32 %v117_v25  ;;  %v170_v38 = vsel %vm96_vm0, %v164_v34, 0.0 }
  0x98   :  { %v181_v28 = vpop.permute.xlu1 %180  ;;  %v149_v37 = vpop.permute.xlu0 %148  ;;  %p342_p4 = pnand %p341_p3, %p335_p0 }
  0x99   :  { %vm159_vm2 = vcmp.eq.s32.totalorder %v146_v29, %v149_v37  ;;  %vm191_vm4 = vcmp.eq.s32.totalorder %v146_v29, %v181_v28 }
  0x9a   :  { %v163_v45 = vsel %vm159_vm2, %v109_v16, 0.0  ;;  %v195_v50 = vsel %vm191_vm4, %v109_v16, 0.0 }
  0x9b   :  { %v167_v48 = vsel %vm96_vm0, %v163_v45, 0.0  ;;  %v199_v53 = vsel %vm96_vm0, %v195_v50, 0.0 }
  0x9c   :  { %v184_v30 = vpop.permute.xlu1 %183 }
  0x9d   :  { %vm192_vm3 = vcmp.eq.s32.totalorder %v146_v29, %v184_v30  ;;  %v232_v30 = vshrl.u32 %v145_v27, 7 }
  0x9e   :  { %v319_v31 = vpop.eup %318  ;;  %v196_v44 = vsel %vm192_vm3, %v110_v22, 0.0 }
  0x9f   :  { %v121_v32 = vsel %vm96_vm0, %v319_v31, 0.0  ;;  %v202_v47 = vsel %vm96_vm0, %v196_v44, 0.0  ;;  %v235_v44 = vadd.s32 24, %v232_v30 }
  0xa0   :  { %122 = vadd.xlane.f32.xlu1 %v121_v32 }
  0xa1   :  { %v155_v33 = vpop.permute.xlu1 %154  ;;  %vm244_vm10 = vcmp.lt.s32.totalorder %v235_v44, 30 }
  0xa2   :  { %v321_v35 = vpop.eup %320  ;;  %vm161_vm6 = vcmp.eq.s32.totalorder %v146_v29, %v155_v33 }
  0xa3   :  { %v323_v36 = vpop.eup %322  ;;  %v130_v42 = vsel %vm96_vm0, %v321_v35, 0.0  ;;  %v165_v54 = vsel %vm161_vm6, %v111_v18, 0.0 }
  0xa4   :  { %v124_v39 = vsel %vm96_vm0, %v323_v36, 0.0  ;;  %v325_v40 = vpop.eup %324  ;;  %171 = vadd.xlane.f32.xlu1 %v170_v38  ;;  %v173_v57 = vsel %vm96_vm0, %v165_v54, 0.0 }
  0xa5   :  { %125 = vadd.xlane.f32.xlu0 %v124_v39  ;;  %v127_v43 = vsel %vm96_vm0, %v325_v40, 0.0 }
  0xa6   :  { %v187_v41 = vpop.permute.xlu1 %186 }
  0xa7   :  { %vm193_vm5 = vcmp.eq.s32.totalorder %v146_v29, %v187_v41 }
  0xa8   :  { %131 = vadd.xlane.f32.xlu1 %v130_v42  ;;  %v197_v49 = vsel %vm193_vm5, %v111_v18, 0.0 }
  0xa9   :  { %128 = vadd.xlane.f32.xlu0 %v127_v43  ;;  %v205_v52 = vsel %vm96_vm0, %v197_v49, 0.0 }
  0xab   :  { %v158_v46 = vpop.permute.xlu1 %157 }
  0xac   :  { %203 = vadd.xlane.f32.xlu1 %v202_v47  ;;  %vm162_vm8 = vcmp.eq.s32.totalorder %v146_v29, %v158_v46 }
  0xad   :  { %168 = vadd.xlane.f32.xlu0 %v167_v48  ;;  %v166_v58 = vsel %vm162_vm8, %v112_v21, 0.0 }
  0xae   :  { %v176_v59 = vsel %vm96_vm0, %v166_v58, 0.0  ;;  %v274_v58 = vsub.s32 0, %v232_v30 }
  0xb0   :  { %v190_v51 = vpop.permute.xlu1 %189  ;;  %206 = vadd.xlane.f32.xlu1 %v205_v52 }
  0xb1   :  { %vm194_vm7 = vcmp.eq.s32.totalorder %v146_v29, %v190_v51  ;;  %200 = vadd.xlane.f32.xlu0 %v199_v53 }
  0xb2   :  { %v198_v55 = vsel %vm194_vm7, %v112_v21, 0.0 }
  0xb3   :  { %v208_v56 = vsel %vm96_vm0, %v198_v55, 0.0  ;;  %v253_v55 = vld [vmem:[#allocation2] sm:$0x1] }
  0xb4   :  { %209 = vadd.xlane.f32.xlu1 %v208_v56 }
  0xb5   :  { %174 = vadd.xlane.f32.xlu0 %v173_v57 }
  0xb9   :  { %177 = vadd.xlane.f32.xlu0 %v176_v59 }
 0x129   :  { %v123_v61 = vpop.xlane.xlu1 %122 }
 0x12a   :  { %326 = vlog2.f32 %v123_v61 }
 0x12d   :  { %v172_v62 = vpop.xlane.xlu1 %171 }
 0x12e   :  { %v126_v63 = vpop.xlane.xlu0 %125  ;;  %v213_v13 = vmul.f32 %v211_v5, %v172_v62 }
 0x12f   :  { %328 = vlog2.f32 %v126_v63 }
 0x131   :  { %v132_v0 = vpop.xlane.xlu1 %131 }
 0x132   :  { %v129_v1 = vpop.xlane.xlu0 %128  ;;  %330 = vlog2.f32 %v132_v0 }
 0x133   :  { %332 = vlog2.f32 %v129_v1 }
 0x135   :  { %v204_v2 = vpop.xlane.xlu1 %203 }
 0x136   :  { %v169_v3 = vpop.xlane.xlu0 %168  ;;  %v219_v6 = vmul.f32 %v217_v4, %v204_v2 }
 0x137   :  { %v327_v9 = vpop.eup %326  ;;  %v212_v10 = vmul.f32 %v211_v5, %v169_v3 }
 0x138   :  { %v134_v18 = vmul.f32 0.6931472, %v327_v9  ;;  %v223_v21 = vadd.f32 %v219_v6, %v213_v13 }
 0x139   :  { %v207_v7 = vpop.xlane.xlu1 %206 }
 0x13a   :  { %v201_v8 = vpop.xlane.xlu0 %200  ;;  %v220_v23 = vmul.f32 %v217_v4, %v207_v7  ;;  %v141_v33 = vadd.f32 %v134_v18, %v410_v15  ;;  %v227_v35 = vadd.f32 %v223_v21, %v416_v20 }
 0x13b   :  { %v218_v11 = vmul.f32 %v217_v4, %v201_v8 }
 0x13c   :  { %v329_v12 = vpop.eup %328 }
 0x13d   :  { %v136_v16 = vmul.f32 0.6931472, %v329_v12  ;;  %v222_v17 = vadd.f32 %v218_v11, %v212_v10  ;;  %v210_v29 = vpop.xlane.xlu1 %209 }
 0x13e   :  { %v175_v22 = vpop.xlane.xlu0 %174  ;;  %v221_v38 = vmul.f32 %v217_v4, %v210_v29 }
 0x13f   :  { %v214_v24 = vmul.f32 %v211_v5, %v175_v22  ;;  %v331_v25 = vpop.eup %330  ;;  %v142_v26 = vadd.f32 %v136_v16, %v416_v20  ;;  %v226_v28 = vadd.f32 %v222_v17, %v410_v15 }
 0x140   :  { %v333_v31 = vpop.eup %332  ;;  %v140_v37 = vmul.f32 0.6931472, %v331_v25 }
 0x141   :  { %v224_v32 = vadd.f32 %v220_v23, %v214_v24  ;;  %v138_v34 = vmul.f32 0.6931472, %v333_v31  ;;  %v246_v42 = vsub.f32 %v142_v26, %v227_v35  ;;  %v245_v43 = vsub.f32 %v141_v33, %v226_v28 }
 0x142   :  { %v178_v36 = vpop.xlane.xlu0 %177  ;;  %v144_v46 = vadd.f32 %v140_v37, %v414_v19 }
 0x143   :  { %v228_v39 = vadd.f32 %v224_v32, %v408_v14  ;;  %v215_v40 = vmul.f32 %v211_v5, %v178_v36  ;;  %v143_v41 = vadd.f32 %v138_v34, %v408_v14  ;;  %v254_v47 = vadd.f32 %v246_v42, %v245_v43 }
 0x145   :  { %v225_v45 = vadd.f32 %v221_v38, %v215_v40  ;;  %v247_v27 = vsub.f32 %v143_v41, %v228_v39 }
 0x147   :  { %v229_v15 = vadd.f32 %v225_v45, %v414_v19  ;;  %v255_v48 = vadd.f32 %v254_v47, %v247_v27 }
 0x149   :  { %v248_v20 = vsub.f32 %v144_v46, %v229_v15 }
 0x14b   :  { %v252_v49 = vsel %vm244_vm10, %v248_v20, 0.0 }
 0x14c   :  { %v256_v50 = vadd.f32 %v255_v48, %v252_v49 }
 0x14e   :  { %v257_v51 = vrot.slane %v256_v50, 4 }
 0x150   :  { %v258_v52 = vadd.f32 %v257_v51, %v256_v50 }
 0x152   :  { %v259_v53 = vrot.slane %v258_v52, 2 }
 0x154   :  { %v260_v54 = vadd.f32 %v259_v53, %v258_v52 }
 0x156   :  { %v261_v14 = vrot.slane %v260_v54, 1 }
 0x158   :  { %v262_v56 = vadd.f32 %v261_v14, %v260_v54 }
 0x15a   :  { %v263_v57 = vadd.f32 %v262_v56, %v253_v55 }
 0x15c   :  { %265 = vst.msk [vmem:[#allocation2] sm:$0x1] %vm85_vm9, %v263_v57 }
 0x163   :  { %v269_v59 = vld [vmem:[#allocation2] sm:$0x1] }
 0x164   :  { %v270_v60 = vmul.f32 0.033333335, %v269_v59 }
 0x166   :  { %v275_v19 = vrot.slane %v270_v60, %v274_v58 }
 0x168   :  { %277 = vperm.xlu0 %311, %v275_v19  }
 0x1e3   :  { %v278_v61 = vpop.permute.xlu0 %277 }
 0x1e4   :  { %280 = vst [vmem:[#allocation4] sm:$0xff] %v278_v61 }
 0x1e5   :  { %345 = shalt.err (!%p342_p4)
}
 0x1e6   :  { %290 = dma.vmem_to_hbm [thread:$0]  %s288_s4, 128, %s456_s3, [#allocation5]  }
 0x1e7   :  { %354 = dma.done.wait [#allocation5], 128  }
 0x1e8   :  { %355 = vsyncadd [#allocation5], 4294967168 }
 0x1e9   :  { %294 = vsyncpa [#allocation5], 1 }

</bundles_post_ra>
